<compile_context>
chip_gen: v7x
topology: tpu7x:2x2x1
jax: 0.10.0
libtpu: 0.0.40
codegen_flags: <defaults>
</compile_context>

<pallas_src>
import functools

import jax
import jax.numpy as jnp
from jax import lax
from jax.experimental import pallas as pl
from jax.experimental.pallas import tpu as pltpu


_MXU_DTYPE = jnp.bfloat16   # matmul operand / activation dtype (f32 accumulation)
_VMEM_LIMIT = 48 * 1024 * 1024   # safe on v5e/v6e (128 MiB) and v7x (64 MiB)


# ---------------------------------------------------------------------------
# helpers
# ---------------------------------------------------------------------------
def _tile(dim, preferred, align):
    """Largest tile <= preferred that divides `dim` and is a multiple of `align`;
    fall back to the full dim (always a legal block)."""
    if dim <= preferred:
        return dim
    best = None
    t = align
    while t <= preferred:
        if dim % t == 0:
            best = t
        t += align
    if best is not None:
        return best
    # TODO(synk): non-divisible dims fall back to a full-dim block; pad M/N/K
    # upfront (or use a masked ragged last block) for odd shapes like S=197.
    return dim


def _pick_heads_per_block(n_heads, dh):
    """Head group whose ctx/q/k/v columns are lane-dense, targeting ~256 lanes
    (MXU output width); otherwise all heads (block width == H == full dim)."""
    best = None
    for hb in range(1, n_heads + 1):
        if n_heads % hb:
            continue
        w = hb * dh
        if w % 128 == 0 and w <= 512:
            score = abs(w - 256)
            if best is None or score < best[0]:
                best = (score, hb)
    return best[1] if best is not None else n_heads


def _gelu(y):
    # TODO(synk): DistilBERT uses erf-GELU; tanh approximation used (<1e-3 rel diff).
    return 0.5 * y * (1.0 + jnp.tanh(0.7978845608028654 * (y + 0.044715 * y * y * y)))


# ---------------------------------------------------------------------------
# tiled linear (+ optional activation epilogue); bf16 operands, f32 accumulator
# ---------------------------------------------------------------------------
def _linear_kernel(x_ref, w_ref, b_ref, o_ref, acc_ref, *, act):
    @pl.when(pl.program_id(2) == 0)
    def _():
        acc_ref[...] = jnp.zeros_like(acc_ref)

    acc_ref[...] += jnp.dot(x_ref[...], w_ref[...],
                            preferred_element_type=jnp.float32)

    @pl.when(pl.program_id(2) == pl.num_programs(2) - 1)
    def _():
        y = acc_ref[...] + b_ref[...]
        if act == "relu":
            y = jnp.maximum(y, 0.0)
        elif act == "gelu":
            y = _gelu(y)
        o_ref[...] = y.astype(o_ref.dtype)


def linear(x, w, b, act="none", *, tm=512, tn=512, tk=512):
    M, K = x.shape
    N = w.shape[1]
    tm = _tile(M, tm, 8)
    tn = _tile(N, tn, 128)
    tk = _tile(K, tk, 128)
    grid = (M // tm, N // tn, K // tk)
    return pl.pallas_call(
        functools.partial(_linear_kernel, act=act),
        grid=grid,
        out_shape=jax.ShapeDtypeStruct((M, N), x.dtype),
        in_specs=[
            pl.BlockSpec((tm, tk), lambda i, j, k: (i, k)),
            pl.BlockSpec((tk, tn), lambda i, j, k: (k, j)),
            pl.BlockSpec((1, tn), lambda i, j, k: (0, j)),
        ],
        out_specs=pl.BlockSpec((tm, tn), lambda i, j, k: (i, j)),
        scratch_shapes=[pltpu.VMEM((tm, tn), jnp.float32)],
        compiler_params=pltpu.CompilerParams(
            dimension_semantics=("parallel", "parallel", "arbitrary"),
            vmem_limit_bytes=_VMEM_LIMIT),
    )(x, w, b.reshape(1, N))


# ---------------------------------------------------------------------------
# fused: matmul + bias + residual add + LayerNorm (epilogue on f32 accumulator)
# ---------------------------------------------------------------------------
def _matmul_add_ln_kernel(x_ref, w_ref, b_ref, r_ref, g_ref, be_ref, o_ref,
                          acc_ref, *, eps):
    @pl.when(pl.program_id(1) == 0)
    def _():
        acc_ref[...] = jnp.zeros_like(acc_ref)

    acc_ref[...] += jnp.dot(x_ref[...], w_ref[...],
                            preferred_element_type=jnp.float32)

    @pl.when(pl.program_id(1) == pl.num_programs(1) - 1)
    def _():
        y = acc_ref[...] + b_ref[...] + r_ref[...].astype(jnp.float32)
        mu = jnp.mean(y, axis=-1, keepdims=True)
        d = y - mu
        var = jnp.mean(d * d, axis=-1, keepdims=True)
        yn = d * lax.rsqrt(var + eps)
        o_ref[...] = (yn * g_ref[...] + be_ref[...]).astype(o_ref.dtype)


def linear_add_layernorm(x, w, b, residual, gamma, beta, *, eps=1e-12,
                         tm=512, tk=512):
    M, K = x.shape
    N = w.shape[1]                       # LN reduces over the full output row
    tm = _tile(M, tm, 8)
    tk = _tile(K, tk, 128)
    grid = (M // tm, K // tk)
    return pl.pallas_call(
        functools.partial(_matmul_add_ln_kernel, eps=eps),
        grid=grid,
        out_shape=jax.ShapeDtypeStruct((M, N), x.dtype),
        in_specs=[
            pl.BlockSpec((tm, tk), lambda i, k: (i, k)),
            pl.BlockSpec((tk, N), lambda i, k: (k, 0)),
            pl.BlockSpec((1, N), lambda i, k: (0, 0)),
            pl.BlockSpec((tm, N), lambda i, k: (i, 0)),
            pl.BlockSpec((1, N), lambda i, k: (0, 0)),
            pl.BlockSpec((1, N), lambda i, k: (0, 0)),
        ],
        out_specs=pl.BlockSpec((tm, N), lambda i, k: (i, 0)),
        scratch_shapes=[pltpu.VMEM((tm, N), jnp.float32)],
        compiler_params=pltpu.CompilerParams(
            dimension_semantics=("parallel", "arbitrary"),
            vmem_limit_bytes=_VMEM_LIMIT),
    )(x, w, b.reshape(1, N), residual, gamma.reshape(1, N), beta.reshape(1, N))


# ---------------------------------------------------------------------------
# row-tiled LayerNorm (embeddings; no residual -> no zero tensor DMA)
# ---------------------------------------------------------------------------
def _ln_kernel(x_ref, g_ref, b_ref, o_ref, *, eps):
    x = x_ref[...].astype(jnp.float32)
    mu = jnp.mean(x, axis=-1, keepdims=True)
    d = x - mu
    var = jnp.mean(d * d, axis=-1, keepdims=True)
    o_ref[...] = ((d * lax.rsqrt(var + eps)) * g_ref[...] + b_ref[...]
                  ).astype(o_ref.dtype)


def layernorm(x, gamma, beta, *, eps=1e-12, tm=512, out_dtype=None):
    M, H = x.shape
    out_dtype = out_dtype or x.dtype
    tm = _tile(M, tm, 8)
    return pl.pallas_call(
        functools.partial(_ln_kernel, eps=eps),
        grid=(M // tm,),
        out_shape=jax.ShapeDtypeStruct((M, H), out_dtype),
        in_specs=[
            pl.BlockSpec((tm, H), lambda i: (i, 0)),
            pl.BlockSpec((1, H), lambda i: (0, 0)),
            pl.BlockSpec((1, H), lambda i: (0, 0)),
        ],
        out_specs=pl.BlockSpec((tm, H), lambda i: (i, 0)),
        compiler_params=pltpu.CompilerParams(dimension_semantics=("parallel",)),
    )(x, gamma.reshape(1, H), beta.reshape(1, H))


# ---------------------------------------------------------------------------
# multi-head attention: hb heads per grid step, Q/K/V column blocks selected
# straight out of the fused (B*S, 3H) qkv via index_map (no XLA slices), mask
# bias built in-kernel, ctx written head-by-head into the [B*S, H] layout.
# ---------------------------------------------------------------------------
def _attn_kernel(*refs, scale, hb, dh, hidden, split_qkv):
    if split_qkv:
        q_ref, k_ref, v_ref, mask_ref, ctx_ref, probs_ref = refs
        q_off, k_off, v_off = 0, 0, 0
    else:
        qkv_ref, mask_ref, ctx_ref, probs_ref = refs
        q_ref = k_ref = v_ref = qkv_ref
        q_off, k_off, v_off = 0, hidden, 2 * hidden

    # additive mask bias: (1, S), broadcast against (S, S) scores
    bias = (1.0 - mask_ref[0].astype(jnp.float32)) * -1e9

    for h in range(hb):                       # static unrolled loop over heads
        q = q_ref[:, q_off + h * dh:q_off + (h + 1) * dh]
        k = k_ref[:, k_off + h * dh:k_off + (h + 1) * dh]
        v = v_ref[:, v_off + h * dh:v_off + (h + 1) * dh]
        # Q @ K^T without materializing a transpose (contract the dh axes)
        s = lax.dot_general(q, k, (((1,), (1,)), ((), ())),
                            preferred_element_type=jnp.float32)
        s = s * scale + bias
        m = jnp.max(s, axis=-1, keepdims=True)
        e = jnp.exp(s - m)
        p = e * pl.reciprocal(jnp.sum(e, axis=-1, keepdims=True), approx=True)
        probs_ref[0, h] = p.astype(probs_ref.dtype)
        pv = jnp.dot(p.astype(v.dtype), v, preferred_element_type=jnp.float32)
        ctx_ref[:, h * dh:(h + 1) * dh] = pv.astype(ctx_ref.dtype)


def mha_attention(qkv, mask, scale, *, n_heads, batch, seq, hidden):
    # qkv: (B*S, 3H) activation layout; mask: (B, S)
    M = qkv.shape[0]
    dh = hidden // n_heads
    hb = _pick_heads_per_block(n_heads, dh)
    hpb = n_heads // hb                       # head-blocks per batch element
    grid = (batch * hpb,)
    mask3 = mask.astype(jnp.float32).reshape(batch, 1, seq)
    split = (hb * dh) % 128 == 0              # lane-dense column blocks possible?

    mask_spec = pl.BlockSpec((1, 1, seq), lambda i: (i // hpb, 0, 0))
    if split:
        # select Q / K / V column blocks of the fused qkv directly via index_map
        in_specs = [
            pl.BlockSpec((seq, hb * dh), lambda i: (i // hpb, i % hpb)),
            pl.BlockSpec((seq, hb * dh), lambda i: (i // hpb, hpb + i % hpb)),
            pl.BlockSpec((seq, hb * dh), lambda i: (i // hpb, 2 * hpb + i % hpb)),
            mask_spec,
        ]
        args = (qkv, qkv, qkv, mask3)
    else:
        # toy/fallback path: one full-width block, static slices in-kernel
        in_specs = [pl.BlockSpec((seq, 3 * hidden), lambda i: (i // hpb, 0)),
                    mask_spec]
        args = (qkv, mask3)

    return pl.pallas_call(
        functools.partial(_attn_kernel, scale=scale, hb=hb, dh=dh,
                          hidden=hidden, split_qkv=split),
        grid=grid,
        out_shape=(
            jax.ShapeDtypeStruct((M, hidden), qkv.dtype),                 # ctx
            jax.ShapeDtypeStruct((batch, n_heads, seq, seq), qkv.dtype),  # probs (bf16)
        ),
        in_specs=in_specs,
        out_specs=(
            pl.BlockSpec((seq, hb * dh), lambda i: (i // hpb, i % hpb)),
            pl.BlockSpec((1, hb, seq, seq), lambda i: (i // hpb, i % hpb, 0, 0)),
        ),
        compiler_params=pltpu.CompilerParams(dimension_semantics=("parallel",)),
    )(*args)


# ---------------------------------------------------------------------------
# classification head: pre_classifier + ReLU + dropout(eval) + classifier
# ---------------------------------------------------------------------------
def _head_kernel(x_ref, w1_ref, b1_ref, w2_ref, b2_ref, o_ref):
    h = jnp.dot(x_ref[...], w1_ref[...],
                preferred_element_type=jnp.float32) + b1_ref[...]
    h = jnp.maximum(h, 0.0)                   # ReLU; dropout is identity in eval
    y = jnp.dot(h.astype(w2_ref.dtype), w2_ref[...],
                preferred_element_type=jnp.float32) + b2_ref[...]
    o_ref[...] = y.astype(o_ref.dtype)


def classification_head(pooled, w1, b1, w2, b2):
    b, h = pooled.shape
    n_labels = w2.shape[1]
    return pl.pallas_call(
        _head_kernel,
        grid=(1,),
        out_shape=jax.ShapeDtypeStruct((b, n_labels), jnp.float32),
        in_specs=[
            pl.BlockSpec((b, h), lambda i: (0, 0)),
            pl.BlockSpec((h, h), lambda i: (0, 0)),
            pl.BlockSpec((1, h), lambda i: (0, 0)),
            pl.BlockSpec((h, n_labels), lambda i: (0, 0)),
            pl.BlockSpec((1, n_labels), lambda i: (0, 0)),
        ],
        out_specs=pl.BlockSpec((b, n_labels), lambda i: (0, 0)),
    )(pooled, w1, b1.reshape(1, h), w2, b2.reshape(1, n_labels))


# ---------------------------------------------------------------------------
# parameters (deterministic synthetic; Q/K/V pre-fused into (H, 3H); matmul
# weights pre-cast to bf16 once here — embeddings / biases / LN stay f32)
# ---------------------------------------------------------------------------
def init_params(key, vocab, max_pos, hidden, n_heads, ffn, n_layers, n_labels):
    keys = iter(jax.random.split(key, 8 + n_layers * 16))

    def nrm(shape, dtype=jnp.float32, scale=0.02):
        return (scale * jax.random.normal(next(keys), shape)).astype(dtype)

    params = {
        "word_emb": nrm((vocab, hidden)),
        "pos_emb": nrm((max_pos, hidden)),
        "emb_ln_g": jnp.ones((hidden,), jnp.float32),
        "emb_ln_b": jnp.zeros((hidden,), jnp.float32),
        "layers": [],
        "pre_w": nrm((hidden, hidden), _MXU_DTYPE),
        "pre_b": jnp.zeros((hidden,), jnp.float32),
        "cls_w": nrm((hidden, n_labels), _MXU_DTYPE),
        "cls_b": jnp.zeros((n_labels,), jnp.float32),
    }
    for _ in range(n_layers):
        layer = {
            "w_qkv": nrm((hidden, 3 * hidden), _MXU_DTYPE),
            "b_qkv": jnp.zeros((3 * hidden,), jnp.float32),
            "wo": nrm((hidden, hidden), _MXU_DTYPE),
            "bo": jnp.zeros((hidden,), jnp.float32),
            "ln1_g": jnp.ones((hidden,), jnp.float32),
            "ln1_b": jnp.zeros((hidden,), jnp.float32),
            "w1": nrm((hidden, ffn), _MXU_DTYPE),
            "b1": jnp.zeros((ffn,), jnp.float32),
            "w2": nrm((ffn, hidden), _MXU_DTYPE),
            "b2": jnp.zeros((hidden,), jnp.float32),
            "ln2_g": jnp.ones((hidden,), jnp.float32),
            "ln2_b": jnp.zeros((hidden,), jnp.float32),
        }
        params["layers"].append(layer)
    return params


# ---------------------------------------------------------------------------
# forward (ModifiedModel.forward equivalent, eval mode)
# ---------------------------------------------------------------------------
def modified_model_forward(params, input_ids, attention_mask, labels=None,
                           *, n_heads):
    B, S = input_ids.shape
    H = params["word_emb"].shape[1]
    Dh = H // n_heads
    scale = 1.0 / (Dh ** 0.5)

    # embeddings (gather is glue; LN is a Pallas kernel emitting bf16 activations)
    emb = jnp.take(params["word_emb"], input_ids, axis=0) + params["pos_emb"][None, :S, :]
    x = layernorm(emb.reshape(B * S, H), params["emb_ln_g"], params["emb_ln_b"],
                  out_dtype=_MXU_DTYPE)

    hidden_states = [x.reshape(B, S, H)]
    attentions = []

    for layer in params["layers"]:
        # fused QKV projection: one (B*S, H) x (H, 3H) matmul, output stays fused
        qkv = linear(x, layer["w_qkv"], layer["b_qkv"])

        # attention: Q/K/V column blocks taken straight from qkv via BlockSpecs;
        # ctx comes back already in [B*S, H] layout
        ctx, probs = mha_attention(qkv, attention_mask, scale,
                                   n_heads=n_heads, batch=B, seq=S, hidden=H)

        # fused output-projection + residual + LayerNorm
        x = linear_add_layernorm(ctx, layer["wo"], layer["bo"], x,
                                 layer["ln1_g"], layer["ln1_b"])

        # FFN: w1 + GELU (epilogue), then fused w2 + residual + LayerNorm
        ff = linear(x, layer["w1"], layer["b1"], act="gelu")
        x = linear_add_layernorm(ff, layer["w2"], layer["b2"], x,
                                 layer["ln2_g"], layer["ln2_b"])

        hidden_states.append(x.reshape(B, S, H))
        attentions.append(probs)                        # (B, nH, S, S) bf16

    # CLS pool -> pre_classifier + ReLU -> dropout(eval) -> classifier
    pooled = hidden_states[-1][:, 0, :]                 # (B, H)
    logits = classification_head(pooled, params["pre_w"], params["pre_b"],
                                 params["cls_w"], params["cls_b"])

    loss = None
    if labels is not None:
        # cross-entropy over tiny (B, n_labels) logits — JAX glue
        logp = jax.nn.log_softmax(logits.astype(jnp.float32), axis=-1)
        loss = -jnp.mean(jnp.take_along_axis(logp, labels[:, None], axis=1))

    return {
        "logits": logits,
        "loss": loss,
        "hidden_states": tuple(hidden_states),
        "attentions": tuple(attentions),
    }


# ---------------------------------------------------------------------------
if __name__ == "__main__":
    # small but lane-dense shapes (Dh=64 like DistilBERT) so the optimized
    # qkv-column / head-block path is the one being exercised
    B, S, H, NH, FFN = 2, 8, 128, 2, 256
    VOCAB, N_LAYERS, N_LABELS = 100, 2, 3

    key = jax.random.PRNGKey(0)
    kp, kid, kmask, klab = jax.random.split(key, 4)

    params = init_params(kp, VOCAB, S, H, NH, FFN, N_LAYERS, N_LABELS)
    input_ids = jax.random.randint(kid, (B, S), 0, VOCAB, dtype=jnp.int32)
    attention_mask = jnp.ones((B, S), jnp.int32).at[1, 6:].set(0)   # ragged mask
    labels = jax.random.randint(klab, (B,), 0, N_LABELS, dtype=jnp.int32)

    out = modified_model_forward(params, input_ids, attention_mask, labels,
                                 n_heads=NH)
    jax.block_until_ready(out["logits"])
    jax.block_until_ready(out["loss"])
    jax.block_until_ready(out["hidden_states"][-1])
    jax.block_until_ready(out["attentions"][-1])

    assert out["logits"].shape == (B, N_LABELS)
    assert len(out["hidden_states"]) == N_LAYERS + 1
    assert out["hidden_states"][-1].shape == (B, S, H)
    assert len(out["attentions"]) == N_LAYERS
    assert out["attentions"][-1].shape == (B, NH, S, S)
    assert bool(jnp.isfinite(out["loss"]))
    print("KERNEL_OK")
</pallas_src>

<mosaic_0001>
module attributes {stable_mosaic.version = 11 : i64} {
  func.func @_ln_kernel(%arg0: i32, %arg1: memref<16x128xf32, #tpu.memory_space<vmem>>, %arg2: memref<1x128xf32, #tpu.memory_space<vmem>>, %arg3: memref<1x128xf32, #tpu.memory_space<vmem>>, %arg4: memref<16x128xbf16, #tpu.memory_space<vmem>>) attributes {dimension_semantics = [#tpu.dimension_semantics<parallel>], iteration_bounds = array<i64: 1>, scalar_prefetch = 0 : i64, scratch_operands = 0 : i64, tpu.core_type = #tpu.core_type<tc>, window_params = [{transform_indices = @transform_0, window_bounds = array<i64: 16, 128>}, {pipeline_mode = #tpu.pipeline_mode<synchronous>, transform_indices = @transform_1, window_bounds = array<i64: 1, 128>}, {pipeline_mode = #tpu.pipeline_mode<synchronous>, transform_indices = @transform_2, window_bounds = array<i64: 1, 128>}, {transform_indices = @transform_3, window_bounds = array<i64: 16, 128>}]} {
    %c0 = arith.constant 0 : index
    %c0_0 = arith.constant 0 : index
    %0 = vector.load %arg1[%c0, %c0_0] : memref<16x128xf32, #tpu.memory_space<vmem>>, vector<16x128xf32>
    %cst = arith.constant dense<0.000000e+00> : vector<16xf32>
    %1 = vector.multi_reduction <add>, %0, %cst [1] : vector<16x128xf32> to vector<16xf32>
    %2 = vector.shape_cast %1 : vector<16xf32> to vector<16x1xf32>
    %cst_1 = arith.constant 1.280000e+02 : f32
    %3 = vector.broadcast %cst_1 : f32 to vector<16x1xf32>
    %4 = arith.divf %2, %3 : vector<16x1xf32>
    %5 = vector.broadcast %4 : vector<16x1xf32> to vector<16x128xf32>
    %6 = arith.subf %0, %5 : vector<16x128xf32>
    %7 = arith.mulf %6, %6 : vector<16x128xf32>
    %cst_2 = arith.constant dense<0.000000e+00> : vector<16xf32>
    %8 = vector.multi_reduction <add>, %7, %cst_2 [1] : vector<16x128xf32> to vector<16xf32>
    %9 = vector.shape_cast %8 : vector<16xf32> to vector<16x1xf32>
    %cst_3 = arith.constant 1.280000e+02 : f32
    %10 = vector.broadcast %cst_3 : f32 to vector<16x1xf32>
    %11 = arith.divf %9, %10 : vector<16x1xf32>
    %cst_4 = arith.constant 9.99999996E-13 : f32
    %12 = vector.broadcast %cst_4 : f32 to vector<16x1xf32>
    %13 = arith.addf %11, %12 : vector<16x1xf32>
    %14 = math.rsqrt %13 : vector<16x1xf32>
    %15 = vector.broadcast %14 : vector<16x1xf32> to vector<16x128xf32>
    %16 = arith.mulf %6, %15 : vector<16x128xf32>
    %c0_5 = arith.constant 0 : index
    %c0_6 = arith.constant 0 : index
    %17 = vector.load %arg2[%c0_5, %c0_6] : memref<1x128xf32, #tpu.memory_space<vmem>>, vector<1x128xf32>
    %18 = vector.broadcast %17 : vector<1x128xf32> to vector<16x128xf32>
    %19 = arith.mulf %16, %18 : vector<16x128xf32>
    %c0_7 = arith.constant 0 : index
    %c0_8 = arith.constant 0 : index
    %20 = vector.load %arg3[%c0_7, %c0_8] : memref<1x128xf32, #tpu.memory_space<vmem>>, vector<1x128xf32>
    %21 = vector.broadcast %20 : vector<1x128xf32> to vector<16x128xf32>
    %22 = arith.addf %19, %21 : vector<16x128xf32>
    %23 = arith.truncf %22 : vector<16x128xf32> to vector<16x128xbf16>
    %c0_9 = arith.constant 0 : index
    %c0_10 = arith.constant 0 : index
    %24 = vector.load %arg4[%c0_9, %c0_10] : memref<16x128xbf16, #tpu.memory_space<vmem>>, vector<16x128xbf16>
    tpu.vector_store %arg4[%c0_9, %c0_10], %23 {strides = array<i32>} : memref<16x128xbf16, #tpu.memory_space<vmem>>, vector<16x128xbf16>,
    return
  }
  func.func @transform_0(%arg0: i32) -> (i32, i32) {
    %c0_i32 = arith.constant 0 : i32
    %c0_i32_0 = arith.constant 0 : i32
    return %arg0, %c0_i32 : i32, i32
  }
  func.func @transform_1(%arg0: i32) -> (i32, i32) {
    %c0_i32 = arith.constant 0 : i32
    %c0_i32_0 = arith.constant 0 : i32
    %c0_i32_1 = arith.constant 0 : i32
    return %c0_i32, %c0_i32_0 : i32, i32
  }
  func.func @transform_2(%arg0: i32) -> (i32, i32) {
    %c0_i32 = arith.constant 0 : i32
    %c0_i32_0 = arith.constant 0 : i32
    %c0_i32_1 = arith.constant 0 : i32
    return %c0_i32, %c0_i32_0 : i32, i32
  }
  func.func @transform_3(%arg0: i32) -> (i32, i32) {
    %c0_i32 = arith.constant 0 : i32
    %c0_i32_0 = arith.constant 0 : i32
    return %arg0, %c0_i32 : i32, i32
  }
}

</mosaic_0001>

<bundles_post_ra>
// kernel: tpu_custom_call.1
= control target key start
LH: loop header
LB: loop body
LE: loop exit
PB: predicated region body
PF: predicated region fallthrough
CT: control target
= control target key end

     0   :  { %8 = vsyncpa [#allocation3], 0  ;;  %s224_s0 = inlined_call_operand.hbm [shape: f32[16,128], index: 0, kind: input, shape index: {}]   ;;  %s225_s1 = inlined_call_operand.vmem [shape: f32[1,128], index: 1, kind: input, shape index: {}]   ;;  %s226_s2 = inlined_call_operand.vmem [shape: f32[1,128], index: 2, kind: input, shape index: {}]   ;;  %s227_s3 = inlined_call_operand.hbm [shape: bf16[16,128], index: 3, kind: output, shape index: {}]  }
   0x1   :  { %9 = vsyncpa [#allocation4], 0  ;;  %s168_s12 = smov [#allocation2]   ;;  %s120_s16 = scalar_lea.hbm %s224_s0, 256 }
   0x2   :  { %s15_s13 = sshll.u32 %s168_s12, 4  ;;  %p121_p0 = scmp.ne.s32.totalorder %s224_s0, %s120_s16  ;;  %s16_s13 = int_to_ptr.vmem [resolvable:$true] %s15_s13 }
   0x3   :  { %p124_p1 = scmp.lt.u32.totalorder %s120_s16, %s224_s0 }
   0x5   :  { %p126_p2 = pnand %p124_p1, %p121_p0 }
   0x7   :  { %129 = shalt.err (!%p126_p2)
}
   0x8   :  { %s130_s21 = scalar_lea.vmem %s16_s13, 256  ;;  %p135_p4 = scmp.lt.s32.totalorder %s16_s13, %s16_s13 }
   0x9   :  { %p131_p3 = scmp.ne.s32.totalorder %s16_s13, %s130_s21  ;;  %p136_p5 = scmp.lt.s32.totalorder %s130_s21, %s130_s21 }
   0xb   :  { %p137_p6 = por %p136_p5, %p135_p4 }
   0xd   :  { %p138_p7 = pnand %p137_p6, %p131_p3 }
   0xf   :  { %141 = shalt.err (!%p138_p7)
}
  0x10   :  { %s169_s22 = smov 128   ;;  %s170_s23 = smov 8  }
  0x11   :  { %21 = dma.hbm_to_vmem [thread:$0]  %s224_s0, 256, %s16_s13, [#allocation3], %s169_s22, %s169_s22, %s170_s23  }
  0x12   :  { %164 = dma.done.wait [#allocation3], 256  }
  0x13   :  { %165 = vsyncadd [#allocation3], 4294967040  ;;  %v29_v0 = vld [vmem:[#allocation2] sm:$0xff]  ;;  %v30_v1 = vld [vmem:[#allocation2 + $0x8] sm:$0xff]  ;;  %s171_s29 = smov [#allocation5]  }
  0x14   :  { %31 = vadd.xlane.f32.xlu0 %v29_v0  ;;  %v99_v18 = vld [vmem:[%s225_s1] ss:$0 sm:$0xff]  ;;  %s87_s30 = sshll.u32 %s171_s29, 4  ;;  %s88_s30 = int_to_ptr.vmem [resolvable:$true] %s87_s30 }
  0x15   :  { %v100_v22 = vld [vmem:[%s226_s2] ss:$0 sm:$0xff]  ;;  %s142_s4 = scalar_lea.vmem %s88_s30, 128  ;;  %p147_p9 = scmp.lt.s32.totalorder %s88_s30, %s88_s30 }
  0x16   :  { %p143_p8 = scmp.ne.s32.totalorder %s88_s30, %s142_s4  ;;  %p148_p10 = scmp.lt.s32.totalorder %s142_s4, %s142_s4 }
  0x18   :  { %33 = vadd.xlane.f32.xlu0 %v30_v1  ;;  %p149_p11 = por %p148_p10, %p147_p9 }
  0x1a   :  { %p150_p12 = pnand %p149_p11, %p143_p8 }
  0xa1   :  { %v32_v2 = vpop.xlane.xlu0 %31 }
  0xa2   :  { %v36_v3 = vmul.f32 0.0078125, %v32_v2 }
  0xa4   :  { %v38_v4 = vsub.f32 %v29_v0, %v36_v3 }
  0xa5   :  { %v34_v5 = vpop.xlane.xlu0 %33 }
  0xa6   :  { %v37_v6 = vmul.f32 0.0078125, %v34_v5  ;;  %v40_v7 = vmul.f32 %v38_v4, %v38_v4 }
  0xa8   :  { %v39_v8 = vsub.f32 %v30_v1, %v37_v6  ;;  %42 = vadd.xlane.f32.xlu1 %v40_v7 }
  0xaa   :  { %v41_v9 = vmul.f32 %v39_v8, %v39_v8 }
  0xac   :  { %44 = vadd.xlane.f32.xlu1 %v41_v9 }
 0x135   :  { %v43_v10 = vpop.xlane.xlu1 %42 }
 0x136   :  { %v46_v11 = vmul.f32 0.0078125, %v43_v10 }
 0x138   :  { %v48_v12 = vadd.f32 1e-12, %v46_v11 }
 0x139   :  { %v45_v13 = vpop.xlane.xlu1 %44 }
 0x13a   :  { %116 = vrsqrt.f32 %v48_v12  ;;  %v47_v14 = vmul.f32 0.0078125, %v45_v13 }
 0x13c   :  { %v49_v15 = vadd.f32 1e-12, %v47_v14 }
 0x13e   :  { %118 = vrsqrt.f32 %v49_v15 }
 0x144   :  { %v117_v16 = vpop.eup %116 }
 0x145   :  { %v52_v17 = vmul.f32 %v117_v16, %v38_v4 }
 0x147   :  { %v61_v21 = vmul.f32 %v99_v18, %v52_v17 }
 0x148   :  { %v119_v19 = vpop.eup %118 }
 0x149   :  { %v53_v20 = vmul.f32 %v119_v19, %v39_v8  ;;  %v70_v24 = vadd.f32 %v100_v22, %v61_v21 }
 0x14b   :  { %v62_v23 = vmul.f32 %v99_v18, %v53_v20 }
 0x14d   :  { %v71_v25 = vadd.f32 %v100_v22, %v62_v23 }
 0x14f   :  { %v108_v26 = vpack.c.bf16 %v71_v25, %v70_v24 }
 0x151   :  { %109 = vst [vmem:[#allocation5] sm:$0xff] %v108_v26  }
 0x152   :  { %153 = shalt.err (!%p150_p12)
}
 0x153   :  { %s154_s6 = scalar_lea.hbm %s227_s3, 128 }
 0x154   :  { %p155_p13 = scmp.ne.s32.totalorder %s227_s3, %s154_s6  ;;  %p158_p0 = scmp.lt.u32.totalorder %s154_s6, %s227_s3 }
 0x156   :  { %p160_p1 = pnand %p158_p0, %p155_p13 }
 0x158   :  { %163 = shalt.err (!%p160_p1)
}
 0x159   :  { %s172_s10 = smov 64   ;;  %s173_s11 = smov 4  }
 0x15a   :  { %93 = dma.vmem_to_hbm [thread:$0]  %s88_s30, 128, %s227_s3, [#allocation4], %s172_s10, %s172_s10, %s173_s11  }
 0x15b   :  { %166 = dma.done.wait [#allocation4], 128  }
 0x15c   :  { %167 = vsyncadd [#allocation4], 4294967168 }
 0x15d   :  { %97 = vsyncpa [#allocation3], 1 }
 0x15e   :  { %98 = vsyncpa [#allocation4], 1 }

</bundles_post_ra>
